<compile_context>
chip_gen: v7x
topology: tpu7x:2x2x1
jax: 0.10.0
libtpu: 0.0.40
codegen_flags: <defaults>
</compile_context>

<pallas_src>
import functools

import jax
import jax.numpy as jnp
from jax.experimental import pallas as pl
from jax.experimental.pallas import tpu as pltpu


def _vmem_capacity_bytes():
    """Per-core VMEM capacity; conservative fallback if the query fails."""
    try:
        cap = int(pltpu.get_tpu_info().vmem_capacity_bytes)
        if cap >= (16 << 20):
            return cap
    except Exception:
        pass
    return 64 << 20  # conservative: v7x per-TensorCore VMEM


def _conv_bn_act_kernel(x_ref, w_ref, shift_ref, o_ref, *, use_mxu, dot_dtype):
    # x_ref:     (Cin, TM)   activation tile (lane axis = spatial positions)
    # w_ref:     (TN, Cin)   BN-folded 1x1 conv weight tile (f32 in HBM)
    # shift_ref: (TN, 1)     BN-folded bias (f32)
    # o_ref:     (TN, TM)    output tile (lane-dense along spatial axis)
    if use_mxu:
        # bf16 x bf16 -> f32 accumulate: single MXU pass on all generations
        # (f32 dots are decomposed into multiple bf16 passes; v7x has no
        #  native f32 MXU path at all).  Cast happens per-tile, in VMEM,
        # so it adds zero HBM traffic.
        acc = jnp.dot(w_ref[...].astype(dot_dtype),
                      x_ref[...].astype(dot_dtype),
                      preferred_element_type=jnp.float32)
    else:
        # Tiny contraction dim (cin < 8): unrolled outer-product FMAs on the
        # VPU, exact f32.  tile_n is capped by the wrapper so the f32
        # accumulator stays small (store-slot pressure on v5e).
        cin = x_ref.shape[0]
        acc = jnp.zeros(o_ref.shape, jnp.float32)
        for ci in range(cin):  # static, unrolled at trace time
            acc = acc + (w_ref[:, ci:ci + 1].astype(jnp.float32)
                         * x_ref[ci:ci + 1, :].astype(jnp.float32))
    y = acc + shift_ref[...]
    # Hardswish: y * relu6(y + 3) / 6
    o_ref[...] = (y * jnp.clip(y + 3.0, 0.0, 6.0) * (1.0 / 6.0)).astype(o_ref.dtype)


@functools.partial(jax.jit,
                   static_argnames=("max_tile_m", "mxu_min_cin", "mxu_bf16"))
def conv_bn_act(x_nchw, weight, gamma, beta, running_mean, running_var,
                eps=1e-5, *, max_tile_m=8192, mxu_min_cin=8, mxu_bf16=True):
    """1x1 Conv (bias=False) + BatchNorm2d (eval) + Hardswish.

    x_nchw: (N, Cin, H, W)       (f32 or bf16; output keeps this dtype)
    weight: (Cout, Cin, 1, 1)    (PyTorch Conv2d layout)
    mxu_bf16: do the MXU contraction in bf16 (f32 accumulate).  Set False for
              exact-f32 conv at a large MXU-throughput cost.
    returns (N, Cout, H, W)
    """
    n, cin, h, w = x_nchw.shape
    cout = weight.shape[0]
    hw = h * w
    out_dtype = x_nchw.dtype

    # ---- Fold BN (inference) into the conv: y = (scale*W) @ x + shift ----
    inv_std = jax.lax.rsqrt(running_var.astype(jnp.float32) + eps)
    scale = gamma.astype(jnp.float32) * inv_std                 # (Cout,)
    shift = beta.astype(jnp.float32) - running_mean.astype(jnp.float32) * scale
    w_mat = weight.reshape(cout, cin).astype(jnp.float32) * scale[:, None]
    shift_col = shift.reshape(cout, 1)                          # (Cout, 1) f32

    # ---- Free (metadata-only) reshape: NCHW -> (N, Cin, H*W).
    # NOTE: no .astype() here - a wrapper-side cast of x would be a full
    # extra HBM pass around a mem-bound kernel; any casting is per-tile
    # inside the kernel.
    x3 = x_nchw.reshape(n, cin, hw)

    use_mxu = cin >= mxu_min_cin
    dot_dtype = jnp.bfloat16 if mxu_bf16 else jnp.float32

    # ---- Cout tiling ----
    if use_mxu:
        tile_n = 256 if cout > 512 else cout
    else:
        # VPU path: bound the (tile_n, tile_m) f32 accumulator.
        tile_n = min(cout, 128)
    n_tiles = pl.cdiv(cout, tile_n)

    # ---- M (=H*W) tiling from the actual VMEM capacity ----
    vmem_cap = _vmem_capacity_bytes()
    budget = int(0.40 * vmem_cap)          # streaming working-set budget

    xb = jnp.dtype(x_nchw.dtype).itemsize
    ob = jnp.dtype(out_dtype).itemsize
    w_tile_bytes = tile_n * cin * 4 + tile_n * 4     # weight + shift tiles (f32)

    # Weight/shift block index is grid-invariant when n_tiles == 1; single-
    # buffer them only when the VMEM saving is meaningful (wide layers).
    single_buffer_w = (n_tiles == 1) and (w_tile_bytes >= (2 << 20))
    wbuf = 1 if single_buffer_w else 2

    per_m = 2 * (cin * xb + tile_n * ob)   # double-buffered x tile + out tile
    tm_fit = max(128, ((budget - wbuf * w_tile_bytes) // per_m) // 128 * 128)
    tile_m = int(min(max_tile_m, tm_fit))
    if hw <= tile_m:
        # One full-extent block along M (legal even if not a 128 multiple;
        # for hw < 128 the stores are masked - unavoidable without a padded
        # copy, which would cost a full extra HBM pass).
        tile_m = hw
    else:
        # Prefer a 128-multiple tile that divides hw exactly (avoids a masked
        # vst.msk tail tile), as long as it doesn't shrink the tile too much.
        best = 0
        for t in range(tile_m, 127, -128):
            if hw % t == 0:
                best = t
                break
        if best >= max(128, tile_m // 2):
            tile_m = best
    m_tiles = pl.cdiv(hw, tile_m)

    # Grid: Cout-tile axis innermost so the big x tile stays resident in VMEM
    # across Cout tiles (only the small weight tile is re-fetched).
    grid = (n, m_tiles, n_tiles)

    # Explicit VMEM limit: estimate + 16 MiB headroom, capped under capacity.
    vmem_est = (2 * cin * tile_m * xb        # x tile, double-buffered
                + 2 * tile_n * tile_m * ob   # out tile, double-buffered
                + wbuf * w_tile_bytes)       # weight + shift
    vmem_limit = int(max(16 << 20,
                         min(vmem_cap - (16 << 20),
                             max(32 << 20, vmem_est + (16 << 20)))))

    kernel = functools.partial(_conv_bn_act_kernel,
                               use_mxu=use_mxu, dot_dtype=dot_dtype)

    x_spec = pl.BlockSpec((None, cin, tile_m), lambda b, m, j: (b, 0, m))
    if single_buffer_w:
        w_spec = pl.BlockSpec((tile_n, cin), lambda b, m, j: (j, 0),
                              pipeline_mode=pl.Buffered(1))
        s_spec = pl.BlockSpec((tile_n, 1), lambda b, m, j: (j, 0),
                              pipeline_mode=pl.Buffered(1))
    else:
        w_spec = pl.BlockSpec((tile_n, cin), lambda b, m, j: (j, 0))
        s_spec = pl.BlockSpec((tile_n, 1), lambda b, m, j: (j, 0))
    out_spec = pl.BlockSpec((None, tile_n, tile_m), lambda b, m, j: (b, j, m))

    out3 = pl.pallas_call(
        kernel,
        out_shape=jax.ShapeDtypeStruct((n, cout, hw), out_dtype),
        grid_spec=pltpu.PrefetchScalarGridSpec(
            num_scalar_prefetch=0,
            grid=grid,
            in_specs=[x_spec, w_spec, s_spec],
            out_specs=out_spec,
        ),
        compiler_params=pltpu.CompilerParams(
            dimension_semantics=("parallel", "parallel", "parallel"),
            vmem_limit_bytes=vmem_limit),
    )(x3, w_mat, shift_col)

    # Free (metadata-only) reshape back to NCHW.
    return out3.reshape(n, cout, h, w)


def _reference(x_nchw, weight, gamma, beta, running_mean, running_var, eps=1e-5):
    """Plain-JAX reference for the same forward pass (NCHW in/out)."""
    cout, cin = weight.shape[0], weight.shape[1]
    wm = weight.reshape(cout, cin)
    y = jnp.einsum("oi,nihw->nohw", wm, x_nchw, precision="highest")
    scale = gamma / jnp.sqrt(running_var + eps)
    shift = beta - running_mean * scale
    y = y * scale[None, :, None, None] + shift[None, :, None, None]
    return y * jnp.clip(y + 3.0, 0.0, 6.0) / 6.0


def _rand_case(key, n, cin, h, w, cout):
    ks = jax.random.split(key, 6)
    x = jax.random.normal(ks[0], (n, cin, h, w), dtype=jnp.float32)
    wt = jax.random.normal(ks[1], (cout, cin, 1, 1), dtype=jnp.float32) * 0.1
    g = 1.0 + 0.1 * jax.random.normal(ks[2], (cout,), dtype=jnp.float32)
    b = 0.1 * jax.random.normal(ks[3], (cout,), dtype=jnp.float32)
    m = 0.1 * jax.random.normal(ks[4], (cout,), dtype=jnp.float32)
    v = jnp.abs(1.0 + 0.1 * jax.random.normal(ks[5], (cout,), dtype=jnp.float32))
    return x, wt, g, b, m, v


if __name__ == "__main__":
    root = jax.random.PRNGKey(0)
    k1, k2, k3, k4 = jax.random.split(root, 4)

    # 1) Tiny 1x1 block (module's typical bottleneck): cin=4 -> exact-f32 VPU path.
    x, wt, g, b, m, v = _rand_case(k1, 2, 4, 16, 16, 8)
    out = jax.block_until_ready(conv_bn_act(x, wt, g, b, m, v))
    ref = _reference(x, wt, g, b, m, v)
    assert out.shape == (2, 8, 16, 16)
    assert jnp.allclose(out, ref, atol=1e-4, rtol=1e-4), "VPU (f32) path mismatch"

    # 2) Wider channels: cin=64 -> MXU path (bf16 dot, f32 accumulate) ...
    x2, w2, g2, b2, m2, v2 = _rand_case(k2, 1, 64, 16, 16, 128)
    out2 = jax.block_until_ready(conv_bn_act(x2, w2, g2, b2, m2, v2))
    ref2 = _reference(x2, w2, g2, b2, m2, v2)
    assert out2.shape == (1, 128, 16, 16)
    assert jnp.allclose(out2, ref2, atol=3e-2, rtol=3e-2), "MXU (bf16) path mismatch"

    # ... and the exact-f32 MXU fallback (mxu_bf16=False).
    out2f = jax.block_until_ready(
        conv_bn_act(x2, w2, g2, b2, m2, v2, mxu_bf16=False))
    assert jnp.allclose(out2f, ref2, atol=2e-2, rtol=2e-2), "MXU (f32) path mismatch"

    # 3) Larger spatial extent: exercises multi-M-tile pipeline and the
    #    divide-hw tile selection (hw = 9216 -> tile_m = 4608, 2 tiles).
    x3, w3, g3, b3, m3, v3 = _rand_case(k3, 1, 8, 96, 96, 16)
    out3 = jax.block_until_ready(conv_bn_act(x3, w3, g3, b3, m3, v3))
    ref3 = _reference(x3, w3, g3, b3, m3, v3)
    assert out3.shape == (1, 16, 96, 96)
    assert jnp.allclose(out3, ref3, atol=3e-2, rtol=3e-2), "multi-M-tile mismatch"

    # 4) Wide cout (> 512): exercises n_tiles > 1 with the Cout axis innermost
    #    (x tile stays VMEM-resident) and the padded/masked last Cout tile.
    x4, w4, g4, b4, m4, v4 = _rand_case(k4, 1, 32, 8, 8, 640)
    out4 = jax.block_until_ready(conv_bn_act(x4, w4, g4, b4, m4, v4))
    ref4 = _reference(x4, w4, g4, b4, m4, v4)
    assert out4.shape == (1, 640, 8, 8)
    assert jnp.allclose(out4, ref4, atol=3e-2, rtol=3e-2), "wide-Cout mismatch"

    print("KERNEL_OK")
</pallas_src>

<mosaic_0001>
module attributes {stable_mosaic.version = 11 : i64} {
  func.func @_conv_bn_act_kernel(%arg0: i32, %arg1: i32, %arg2: i32, %arg3: memref<1x4x256xf32, #tpu.memory_space<vmem>>, %arg4: memref<8x4xf32, #tpu.memory_space<vmem>>, %arg5: memref<8x1xf32, #tpu.memory_space<vmem>>, %arg6: memref<1x8x256xf32, #tpu.memory_space<vmem>>) attributes {dimension_semantics = [#tpu.dimension_semantics<parallel>, #tpu.dimension_semantics<parallel>, #tpu.dimension_semantics<parallel>], iteration_bounds = array<i64: 2, 1, 1>, scalar_prefetch = 0 : i64, scratch_operands = 0 : i64, tpu.core_type = #tpu.core_type<tc>, window_params = [{transform_indices = @transform_0, window_bounds = array<i64: 1, 4, 256>}, {transform_indices = @transform_1, window_bounds = array<i64: 8, 4>}, {transform_indices = @transform_2, window_bounds = array<i64: 8, 1>}, {transform_indices = @transform_3, window_bounds = array<i64: 1, 8, 256>}]} {
    %cst = arith.constant 0.000000e+00 : f32
    %0 = vector.broadcast %cst : f32 to vector<8x256xf32>
    %c0 = arith.constant 0 : index
    %c0_0 = arith.constant 0 : index
    %1 = vector.load %arg4[%c0, %c0_0] : memref<8x4xf32, #tpu.memory_space<vmem>>, vector<8x1xf32>
    %c0_1 = arith.constant 0 : index
    %c0_2 = arith.constant 0 : index
    %c0_3 = arith.constant 0 : index
    %2 = vector.load %arg3[%c0_1, %c0_2, %c0_3] : memref<1x4x256xf32, #tpu.memory_space<vmem>>, vector<1x1x256xf32>
    %3 = vector.shape_cast %2 : vector<1x1x256xf32> to vector<1x256xf32>
    %4 = vector.broadcast %1 : vector<8x1xf32> to vector<8x256xf32>
    %5 = vector.broadcast %3 : vector<1x256xf32> to vector<8x256xf32>
    %6 = arith.mulf %4, %5 : vector<8x256xf32>
    %7 = arith.addf %0, %6 : vector<8x256xf32>
    %c0_4 = arith.constant 0 : index
    %c1 = arith.constant 1 : index
    %8 = vector.load %arg4[%c0_4, %c1] : memref<8x4xf32, #tpu.memory_space<vmem>>, vector<8x1xf32>
    %c0_5 = arith.constant 0 : index
    %c1_6 = arith.constant 1 : index
    %c0_7 = arith.constant 0 : index
    %9 = vector.load %arg3[%c0_5, %c1_6, %c0_7] : memref<1x4x256xf32, #tpu.memory_space<vmem>>, vector<1x1x256xf32>
    %10 = vector.shape_cast %9 : vector<1x1x256xf32> to vector<1x256xf32>
    %11 = vector.broadcast %8 : vector<8x1xf32> to vector<8x256xf32>
    %12 = vector.broadcast %10 : vector<1x256xf32> to vector<8x256xf32>
    %13 = arith.mulf %11, %12 : vector<8x256xf32>
    %14 = arith.addf %7, %13 : vector<8x256xf32>
    %c0_8 = arith.constant 0 : index
    %c2 = arith.constant 2 : index
    %15 = vector.load %arg4[%c0_8, %c2] : memref<8x4xf32, #tpu.memory_space<vmem>>, vector<8x1xf32>
    %c0_9 = arith.constant 0 : index
    %c2_10 = arith.constant 2 : index
    %c0_11 = arith.constant 0 : index
    %16 = vector.load %arg3[%c0_9, %c2_10, %c0_11] : memref<1x4x256xf32, #tpu.memory_space<vmem>>, vector<1x1x256xf32>
    %17 = vector.shape_cast %16 : vector<1x1x256xf32> to vector<1x256xf32>
    %18 = vector.broadcast %15 : vector<8x1xf32> to vector<8x256xf32>
    %19 = vector.broadcast %17 : vector<1x256xf32> to vector<8x256xf32>
    %20 = arith.mulf %18, %19 : vector<8x256xf32>
    %21 = arith.addf %14, %20 : vector<8x256xf32>
    %c0_12 = arith.constant 0 : index
    %c3 = arith.constant 3 : index
    %22 = vector.load %arg4[%c0_12, %c3] : memref<8x4xf32, #tpu.memory_space<vmem>>, vector<8x1xf32>
    %c0_13 = arith.constant 0 : index
    %c3_14 = arith.constant 3 : index
    %c0_15 = arith.constant 0 : index
    %23 = vector.load %arg3[%c0_13, %c3_14, %c0_15] : memref<1x4x256xf32, #tpu.memory_space<vmem>>, vector<1x1x256xf32>
    %24 = vector.shape_cast %23 : vector<1x1x256xf32> to vector<1x256xf32>
    %25 = vector.broadcast %22 : vector<8x1xf32> to vector<8x256xf32>
    %26 = vector.broadcast %24 : vector<1x256xf32> to vector<8x256xf32>
    %27 = arith.mulf %25, %26 : vector<8x256xf32>
    %28 = arith.addf %21, %27 : vector<8x256xf32>
    %c0_16 = arith.constant 0 : index
    %c0_17 = arith.constant 0 : index
    %29 = vector.load %arg5[%c0_16, %c0_17] : memref<8x1xf32, #tpu.memory_space<vmem>>, vector<8x1xf32>
    %30 = vector.broadcast %29 : vector<8x1xf32> to vector<8x256xf32>
    %31 = arith.addf %28, %30 : vector<8x256xf32>
    %cst_18 = arith.constant 3.000000e+00 : f32
    %32 = vector.broadcast %cst_18 : f32 to vector<8x256xf32>
    %33 = arith.addf %31, %32 : vector<8x256xf32>
    %cst_19 = arith.constant 0.000000e+00 : f32
    %cst_20 = arith.constant 6.000000e+00 : f32
    %34 = vector.broadcast %cst_19 : f32 to vector<8x256xf32>
    %35 = arith.maximumf %34, %33 : vector<8x256xf32>
    %36 = vector.broadcast %cst_20 : f32 to vector<8x256xf32>
    %37 = arith.minimumf %36, %35 : vector<8x256xf32>
    %38 = arith.mulf %31, %37 : vector<8x256xf32>
    %cst_21 = arith.constant 0.166666672 : f32
    %39 = vector.broadcast %cst_21 : f32 to vector<8x256xf32>
    %40 = arith.mulf %38, %39 : vector<8x256xf32>
    %c0_22 = arith.constant 0 : index
    %c0_23 = arith.constant 0 : index
    %c0_24 = arith.constant 0 : index
    %41 = vector.load %arg6[%c0_22, %c0_23, %c0_24] : memref<1x8x256xf32, #tpu.memory_space<vmem>>, vector<1x8x256xf32>
    %42 = vector.shape_cast %41 : vector<1x8x256xf32> to vector<8x256xf32>
    %43 = vector.shape_cast %40 : vector<8x256xf32> to vector<1x8x256xf32>
    tpu.vector_store %arg6[%c0_22, %c0_23, %c0_24], %43 {strides = array<i32>} : memref<1x8x256xf32, #tpu.memory_space<vmem>>, vector<1x8x256xf32>,
    return
  }
  func.func @transform_0(%arg0: i32, %arg1: i32, %arg2: i32) -> (i32, i32, i32) {
    %c0_i32 = arith.constant 0 : i32
    %c0_i32_0 = arith.constant 0 : i32
    return %arg0, %c0_i32, %arg1 : i32, i32, i32
  }
  func.func @transform_1(%arg0: i32, %arg1: i32, %arg2: i32) -> (i32, i32) {
    %c0_i32 = arith.constant 0 : i32
    %c0_i32_0 = arith.constant 0 : i32
    return %arg2, %c0_i32 : i32, i32
  }
  func.func @transform_2(%arg0: i32, %arg1: i32, %arg2: i32) -> (i32, i32) {
    %c0_i32 = arith.constant 0 : i32
    %c0_i32_0 = arith.constant 0 : i32
    return %arg2, %c0_i32 : i32, i32
  }
  func.func @transform_3(%arg0: i32, %arg1: i32, %arg2: i32) -> (i32, i32, i32) {
    %c0_i32 = arith.constant 0 : i32
    return %arg0, %arg2, %arg1 : i32, i32, i32
  }
}

</mosaic_0001>

<bundles_post_ra>
// kernel: conv_bn_act.1
= control target key start
LH: loop header
LB: loop body
LE: loop exit
PB: predicated region body
PF: predicated region fallthrough
CT: control target
= control target key end

     0   :  { %s602_s12 = smov 0   ;;  %s604_s13 = smov 0   ;;  %s645_s0 = inlined_call_operand.vmem [shape: f32[2,4,256], index: 0, kind: input, shape index: {}]   ;;  %s646_s1 = inlined_call_operand.vmem [shape: f32[8,4], index: 1, kind: input, shape index: {}]   ;;  %s647_s2 = inlined_call_operand.vmem [shape: f32[8,1], index: 2, kind: input, shape index: {}]   ;;  %s648_s3 = inlined_call_operand.vmem [shape: f32[2,8,256], index: 3, kind: output, shape index: {}]  }
   0x1   :  { %s606_s14 = smov 0  }
   0x2 LB: > { %s32_s15 = sadd.s32 1, %s572_s13  ;;  %p508_p0 = scmp.ge.s32.totalorder %s576_s14, 1  ;;  %s576_s14 = sphi %s606_s14, %s13_s14   ;;  %s572_s13 = sphi %s604_s13, %s650_s13   ;;  %s568_s12 = sphi %s602_s12, %s649_s12  }
   0x3   : > { %p34_p1 = scmp.ge.s32.totalorder %s32_s15, 2  ;;  %p185_p2 = scmp.lt.s32.totalorder %s576_s14, 3 }
   0x5   : > { %s652_s15 = smov (%p34_p1, %s32_s15), 0  ;;  %p186_p3 = pnand %p508_p0, %p185_p2 }
   0x6   : > { %v261_v0 = vld [vmem:[%s646_s1] sm:$0xff] (!%p186_p3)  ;;  %v578_v1 = vmov (!%p186_p3), 0   ;;  %v579_v2 = vmov (!%p186_p3), 2   ;;  %v580_v3 = vmov (!%p186_p3), 1   ;;  %v581_v4 = vmov (!%p186_p3), 3   ;;  %p230_p4 = scmp.lt.s32.totalorder (!%p186_p3), %s568_s12, 1 }
   0x7   : > { %189 = sbr.rel (%p186_p3) target bundleno = 162 (0xa2), region = 32  ;;  %548 = vset.pattern.permute.xlu0 (!%p186_p3), %v578_v1  ;;  %550 = vset.pattern.permute.xlu1 (!%p186_p3), %v579_v2  ;;  %v346_v5 = vld [vmem:[%s647_s2] sm:$0xff] (!%p186_p3)  ;;  %v269_v6 = vlaneseq (!%p186_p3) }
   0x8   : > { %265 = vperm.xlu0 (!%p186_p3), %548, %v261_v0   ;;  %307 = vperm.xlu1 (!%p186_p3), %550, %v261_v0  }
   0x9   : > { %v270_v7 = vshrl.u32 (!%p186_p3), %v269_v6, 7 }
   0xb   : > { %v271_v8 = vsub.s32 (!%p186_p3), 0, %v270_v7  ;;  %v275_v9 = vsub.s32 (!%p186_p3), 1, %v270_v7 }
   0xc   : > { %549 = vset.pattern.permute.xlu0 (!%p186_p3), %v580_v3  ;;  %551 = vset.pattern.permute.xlu1 (!%p186_p3), %v581_v4 }
   0xd   : > { %286 = vperm.xlu0 (!%p186_p3), %549, %v261_v0   ;;  %328 = vperm.xlu1 (!%p186_p3), %551, %v261_v0  }
   0xe   : > { %s654_s12 = smov (!%p230_p4, %s568_s12), 1 }
   0xf   : > { %s518_s20 = sshll.u32 %s654_s12, 3  ;;  %s519_s24 = sshll.u32 %s654_s12, 4 }
  0x10   : > { %s237_s23 = scalar_lea.vmem %s645_s0, %s518_s20  ;;  %s259_s27 = scalar_lea.vmem %s648_s3, %s519_s24 }
  0x11   : > { %552 = vset.pattern.permute.xlu1 %v578_v1  ;;  %553 = vset.pattern.permute.xlu0 %v578_v1  ;;  %v262_v10 = vld [vmem:[%s237_s23] ss:$4 sm:$0x3]  ;;  %v513_v11 = vld [vmem:[%s237_s23 + $0x1] ss:$4 sm:$0x3] }
  0x12   : > { %349 = vperm.xlu1 %552, %v346_v5   ;;  %v514_v14 = vld [vmem:[%s237_s23 + $0x2] ss:$4 sm:$0x3]  ;;  %v515_v15 = vld [vmem:[%s237_s23 + $0x3] ss:$4 sm:$0x3]  ;;  %v272_v16 = vrot.slane %v262_v10, %v271_v8  ;;  %v276_v17 = vrot.slane %v262_v10, %v275_v9  ;;  %v293_v18 = vrot.slane %v513_v11, %v271_v8  ;;  %v297_v19 = vrot.slane %v513_v11, %v275_v9 }
  0x13   : > { %v314_v20 = vrot.slane %v514_v14, %v271_v8  ;;  %v318_v21 = vrot.slane %v514_v14, %v275_v9  ;;  %v335_v22 = vrot.slane %v515_v15, %v271_v8  ;;  %v339_v23 = vrot.slane %v515_v15, %v275_v9 }
  0x87   : > { %v266_v12 = vpop.permute.xlu0 %265  ;;  %v308_v13 = vpop.permute.xlu1 %307 }
  0x88   : > { %v279_v26 = vmul.f32 %v272_v16, %v266_v12  ;;  %v280_v27 = vmul.f32 %v276_v17, %v266_v12  ;;  %v321_v30 = vmul.f32 %v314_v20, %v308_v13  ;;  %v322_v31 = vmul.f32 %v318_v21, %v308_v13 }
  0x8c   : > { %v287_v24 = vpop.permute.xlu0 %286  ;;  %v329_v25 = vpop.permute.xlu1 %328 }
  0x8d   : > { %v300_v28 = vmul.f32 %v293_v18, %v287_v24  ;;  %v301_v29 = vmul.f32 %v297_v19, %v287_v24  ;;  %v342_v34 = vmul.f32 %v335_v22, %v329_v25  ;;  %v343_v35 = vmul.f32 %v339_v23, %v329_v25 }
  0x8f   : > { %v302_v32 = vadd.f32 %v300_v28, %v279_v26  ;;  %v303_v33 = vadd.f32 %v301_v29, %v280_v27 }
  0x91   : > { %v323_v36 = vadd.f32 %v321_v30, %v302_v32  ;;  %v324_v37 = vadd.f32 %v322_v31, %v303_v33  ;;  %v350_v38 = vpop.permute.xlu1 %349 }
  0x93   : > { %v344_v39 = vadd.f32 %v342_v34, %v323_v36  ;;  %v345_v40 = vadd.f32 %v343_v35, %v324_v37 }
  0x95   : > { %v352_v41 = vadd.f32 %v350_v38, %v344_v39  ;;  %v353_v42 = vadd.f32 %v350_v38, %v345_v40 }
  0x97   : > { %v354_v43 = vadd.f32 3.0, %v352_v41  ;;  %v355_v44 = vadd.f32 3.0, %v353_v42 }
  0x99   : > { %v356_v45 = vmax.f32 %v354_v43, 0.0  ;;  %v357_v46 = vmax.f32 %v355_v44, 0.0 }
  0x9b   : > { %v358_v47 = vmin.f32 %v356_v45, 6.0  ;;  %v359_v48 = vmin.f32 %v357_v46, 6.0 }
  0x9d   : > { %v360_v49 = vmul.f32 %v358_v47, %v352_v41  ;;  %v361_v50 = vmul.f32 %v359_v48, %v353_v42 }
  0x9f   : > { %v362_v51 = vmul.f32 0.16666667, %v360_v49  ;;  %v363_v52 = vmul.f32 0.16666667, %v361_v50 }
  0xa1   : > { %364 = vst [vmem:[%s259_s27] sm:$0xff] %v362_v51  ;;  %365 = vst [vmem:[%s259_s27 + $0x8] sm:$0xff] %v363_v52 }
  0xa2 PF: > { %s13_s14 = sadd.s32 1, %s576_s14   ;;  %s649_s12 = smov %s572_s13 }
  0xa3   : > { %p10_p5 = scmp.ge.s32.totalorder %s13_s14, 4   ;;  %s650_s13 = smov %s652_s15 }
  0xa5   :  { %12 = sbr.rel (!%p10_p5) target bundleno = 2 (0x2), region = 71 }

</bundles_post_ra>
